<compile_context>
chip_gen: v6e
topology: v6e:2x2x1
jax: 0.10.0
libtpu: 0.0.40
codegen_flags: <defaults>
</compile_context>

<pallas_src>
import math

import jax
import jax.numpy as jnp
from jax.experimental import pallas as pl
from jax.experimental.pallas import tpu as pltpu


def _round_up(x, m):
    return ((x + m - 1) // m) * m


def _tpu_profile():
    """Generation-aware tiling / dtype policy."""
    try:
        kind = jax.devices()[0].device_kind.lower()
    except Exception:
        kind = ""
    if "v7" in kind or "7x" in kind:
        # 64 MiB VMEM per TensorCore, 2 TCs, bf16 EUP/VPU/MXU.
        return dict(max_tile=1024, small_max=1024, vmem_limit=48 * 1024 * 1024,
                    stream_dtype=jnp.bfloat16, compute_dtype=jnp.bfloat16)
    if "v6" in kind:
        # 128 MiB VMEM, bf16 EUP/VPU/MXU.
        return dict(max_tile=2048, small_max=1024, vmem_limit=96 * 1024 * 1024,
                    stream_dtype=jnp.bfloat16, compute_dtype=jnp.bfloat16)
    if "v5 lite" in kind or "v5e" in kind or "v5lite" in kind:
        # 128 MiB VMEM, no bf16 EUP/VPU: bf16 HBM stream, f32 compute.
        return dict(max_tile=2048, small_max=1024, vmem_limit=96 * 1024 * 1024,
                    stream_dtype=jnp.bfloat16, compute_dtype=jnp.float32)
    # Unknown chip: conservative, exact f32 everywhere.
    return dict(max_tile=1024, small_max=1024, vmem_limit=64 * 1024 * 1024,
                stream_dtype=jnp.float32, compute_dtype=jnp.float32)


def _choose_tile(num_nodes, max_tile):
    """Largest tile (multiple of 128, <= max_tile) minimizing the padded N."""
    best = None
    for t in range(max_tile, 127, -128):
        n_pad = _round_up(max(num_nodes, t), t)
        if best is None or n_pad < best[1]:
            best = (t, n_pad)
    return best


def _choose_strip(tile):
    """Row-strip size for strip-mining the dist tile (must divide tile)."""
    for s in (512, 448, 384, 320, 256, 192, 128):
        if tile % s == 0:
            return s
    return tile


# ---------------------------------------------------------------------------
# Kernels
# ---------------------------------------------------------------------------
def _make_small_kernel(half_scale, gain, compute_dtype):
    """Single-block fused transform + matmul (whole problem resident in VMEM)."""

    def kernel(flow_ref, dist_ref, out_ref):
        d = dist_ref[...].astype(compute_dtype)
        # gamma / gain  (gain = exp(half_scale) applied to the f32 result)
        g = jnp.exp(half_scale * jnp.tanh(0.5 * d))
        f = flow_ref[...].astype(compute_dtype)
        acc = jnp.dot(f, g, preferred_element_type=jnp.float32)
        out_ref[...] = (gain * acc).astype(out_ref.dtype)

    return kernel


def _make_tiled_kernel(half_scale, gain, tile, strip, compute_dtype):
    """Tiled fused transform + matmul.

    grid = (output-column tiles j, reduction tiles k); k is last ("arbitrary").
    The f32 output block (index_map (0, j)) stays resident across k and is the
    accumulator.  Flow is fully resident; the dist tile is strip-mined so only
    a (strip, tile) gamma temporary is live between EUP and MXU.
    """
    n_strips = tile // strip

    def kernel(flow_ref, dist_ref, out_ref):
        k = pl.program_id(1)

        @pl.when(k == 0)
        def _init():
            out_ref[...] = jnp.zeros_like(out_ref)

        # Columns of the resident flow operand belonging to this K tile.
        col0 = pl.multiple_of(k * tile, 128)
        f_tile = flow_ref[:, pl.ds(col0, tile)].astype(compute_dtype)

        for s in range(n_strips):
            d = dist_ref[s * strip:(s + 1) * strip, :].astype(compute_dtype)
            g = jnp.exp(half_scale * jnp.tanh(0.5 * d))
            out_ref[...] += jnp.dot(f_tile[:, s * strip:(s + 1) * strip], g,
                                    preferred_element_type=jnp.float32)

        @pl.when(k == pl.num_programs(1) - 1)
        def _finalize():
            out_ref[...] = out_ref[...] * gain

    return kernel


# ---------------------------------------------------------------------------
# Wrapper
# ---------------------------------------------------------------------------
def traffic_flow_forward(current_flow, distance_mat, lambda_=0.1, v_norm=10.0,
                         force_f32=False):
    """Pallas equivalent of TrafficFlowModel.forward.

    Args:
      current_flow: f32 [batch, num_nodes]
      distance_mat: f32 [num_nodes, num_nodes] (raw parameter, pre-sigmoid)
      force_f32:    disable the bf16 fast path (exact f32 everywhere)
    Returns:
      f32 [batch, num_nodes]
    """
    batch, num_nodes = current_flow.shape
    assert distance_mat.shape == (num_nodes, num_nodes)

    prof = _tpu_profile()
    stream_dtype = jnp.float32 if force_f32 else prof["stream_dtype"]
    compute_dtype = jnp.float32 if force_f32 else prof["compute_dtype"]

    # Fold the scalar hyper-parameters into trace-time constants.
    half_scale = -0.5 * lambda_ * 1000.0 / v_norm
    gain = math.exp(half_scale)

    b_pad = _round_up(max(batch, 8), 8)
    n_pad0 = _round_up(max(num_nodes, 128), 128)

    small = n_pad0 <= prof["small_max"]
    if small:
        tile, n_pad = n_pad0, n_pad0
    else:
        tile, n_pad = _choose_tile(num_nodes, prof["max_tile"])

    def _prep(x, rows, cols):
        x = x.astype(jnp.float32)
        pr, pc = rows - x.shape[0], cols - x.shape[1]
        if pr or pc:
            x = jnp.pad(x, ((0, pr), (0, pc)))
        return x.astype(stream_dtype)

    # Zero-padded flow columns neutralize the (nonzero) gamma rows coming from
    # zero-padded dist rows; padded output columns are sliced off at the end.
    flow_p = _prep(current_flow, b_pad, n_pad)
    dist_p = _prep(distance_mat, n_pad, n_pad)

    out_shape = jax.ShapeDtypeStruct((b_pad, n_pad), jnp.float32)

    if small:
        out_p = pl.pallas_call(
            _make_small_kernel(half_scale, gain, compute_dtype),
            out_shape=out_shape,
            in_specs=[
                pl.BlockSpec(memory_space=pltpu.MemorySpace.VMEM),
                pl.BlockSpec(memory_space=pltpu.MemorySpace.VMEM),
            ],
            out_specs=pl.BlockSpec(memory_space=pltpu.MemorySpace.VMEM),
            compiler_params=pltpu.CompilerParams(
                vmem_limit_bytes=prof["vmem_limit"],
            ),
        )(flow_p, dist_p)
    else:
        strip = _choose_strip(tile)
        grid = (n_pad // tile, n_pad // tile)  # (output columns j, reduction k)
        out_p = pl.pallas_call(
            _make_tiled_kernel(half_scale, gain, tile, strip, compute_dtype),
            out_shape=out_shape,
            grid_spec=pltpu.PrefetchScalarGridSpec(
                num_scalar_prefetch=0,
                grid=grid,
                in_specs=[
                    # Flow: fully resident (constant index_map -> single DMA).
                    pl.BlockSpec((b_pad, n_pad), lambda j, k: (0, 0)),
                    # Dist tile: rows = reduction k, cols = output tile j.
                    pl.BlockSpec((tile, tile), lambda j, k: (k, j)),
                ],
                out_specs=pl.BlockSpec((b_pad, tile), lambda j, k: (0, j)),
            ),
            compiler_params=pltpu.CompilerParams(
                dimension_semantics=("parallel", "arbitrary"),
                vmem_limit_bytes=prof["vmem_limit"],
            ),
        )(flow_p, dist_p)

    return out_p[:batch, :num_nodes]


def _reference(current_flow, distance_mat, lambda_=0.1, v_norm=10.0):
    distances = jax.nn.sigmoid(distance_mat) * 1000.0
    gamma = jnp.exp(-lambda_ * distances / v_norm)
    return current_flow @ gamma


if __name__ == "__main__":
    key = jax.random.PRNGKey(0)
    k_flow, k_dist, k_flow2, k_dist2 = jax.random.split(key, 4)

    prof = _tpu_profile()
    low_precision = jnp.dtype(prof["stream_dtype"]) != jnp.dtype(jnp.float32)
    tol_small = dict(atol=5e-2, rtol=5e-2) if low_precision else dict(atol=1e-3, rtol=1e-3)
    tol_big = dict(atol=5e-1, rtol=5e-2) if low_precision else dict(atol=5e-3, rtol=5e-3)

    # --- Small shapes consistent with the module (gridless fast path) ---
    batch, num_nodes = 8, 16
    distance_mat = jax.random.normal(k_dist, (num_nodes, num_nodes), jnp.float32)
    current_flow = jax.random.normal(k_flow, (batch, num_nodes), jnp.float32)

    out = jax.block_until_ready(traffic_flow_forward(current_flow, distance_mat))
    ref = _reference(current_flow, distance_mat)
    assert out.shape == (batch, num_nodes)
    assert jnp.allclose(out, ref, **tol_small), float(jnp.max(jnp.abs(out - ref)))

    # Forced-f32 path must match the reference tightly on every chip.
    out_f32 = jax.block_until_ready(
        traffic_flow_forward(current_flow, distance_mat, force_f32=True))
    assert jnp.allclose(out_f32, ref, atol=1e-3, rtol=1e-3)

    # --- Tiled path (grid + K accumulation + finalize scaling) ---
    batch2, num_nodes2 = 4, 2304
    distance_mat2 = jax.random.normal(k_dist2, (num_nodes2, num_nodes2), jnp.float32)
    current_flow2 = jax.random.normal(k_flow2, (batch2, num_nodes2), jnp.float32)

    out2 = jax.block_until_ready(traffic_flow_forward(current_flow2, distance_mat2))
    ref2 = _reference(current_flow2, distance_mat2)
    assert out2.shape == (batch2, num_nodes2)
    assert jnp.allclose(out2, ref2, **tol_big), float(jnp.max(jnp.abs(out2 - ref2)))

    out2_f32 = jax.block_until_ready(
        traffic_flow_forward(current_flow2, distance_mat2, force_f32=True))
    assert jnp.allclose(out2_f32, ref2, atol=5e-3, rtol=5e-3)

    print("KERNEL_OK")
</pallas_src>

<mosaic_0001>
module attributes {stable_mosaic.version = 11 : i64} {
  func.func @kernel(%arg0: memref<8x128xf32, #tpu.memory_space<vmem>>, %arg1: memref<128x128xf32, #tpu.memory_space<vmem>>, %arg2: memref<8x128xf32, #tpu.memory_space<vmem>>) attributes {dimension_semantics = [], scalar_prefetch = 0 : i64, scratch_operands = 0 : i64, tpu.core_type = #tpu.core_type<tc>} {
    %c0 = arith.constant 0 : index
    %c0_0 = arith.constant 0 : index
    %0 = vector.load %arg1[%c0, %c0_0] : memref<128x128xf32, #tpu.memory_space<vmem>>, vector<128x128xf32>
    %cst = arith.constant 5.000000e-01 : f32
    %1 = vector.broadcast %cst : f32 to vector<128x128xf32>
    %2 = arith.mulf %1, %0 : vector<128x128xf32>
    %3 = math.tanh %2 : vector<128x128xf32>
    %cst_1 = arith.constant -5.000000e+00 : f32
    %4 = vector.broadcast %cst_1 : f32 to vector<128x128xf32>
    %5 = arith.mulf %4, %3 : vector<128x128xf32>
    %6 = math.exp %5 : vector<128x128xf32>
    %c0_2 = arith.constant 0 : index
    %c0_3 = arith.constant 0 : index
    %7 = vector.load %arg0[%c0_2, %c0_3] : memref<8x128xf32, #tpu.memory_space<vmem>>, vector<8x128xf32>
    %cst_4 = arith.constant dense<0.000000e+00> : vector<8x128xf32>
    %8 = tpu.matmul %7, %6, %cst_4 {dimension_numbers = #tpu.dot_dimension_numbers<[1], [0], [0], [1], [0, 0, 1, 1], [], []>} : vector<8x128xf32>, vector<128x128xf32>, vector<8x128xf32> -> vector<8x128xf32>
    %cst_5 = arith.constant 0.006737947 : f32
    %9 = vector.broadcast %cst_5 : f32 to vector<8x128xf32>
    %10 = arith.mulf %9, %8 : vector<8x128xf32>
    %c0_6 = arith.constant 0 : index
    %c0_7 = arith.constant 0 : index
    %11 = vector.load %arg2[%c0_6, %c0_7] : memref<8x128xf32, #tpu.memory_space<vmem>>, vector<8x128xf32>
    tpu.vector_store %arg2[%c0_6, %c0_7], %10 {strides = array<i32>} : memref<8x128xf32, #tpu.memory_space<vmem>>, vector<8x128xf32>,
    return
  }
}

</mosaic_0001>

<bundles_post_ra>
// kernel: tpu_custom_call.1
= control target key start
LH: loop header
LB: loop body
LE: loop exit
PB: predicated region body
PF: predicated region fallthrough
CT: control target
= control target key end

     0   :  { %7 = vsyncpa [#allocation3], 0  ;;  %s460_s0 = inlined_call_operand.hbm [shape: f32[8,128], index: 0, kind: input, shape index: {}]   ;;  %s461_s1 = inlined_call_operand.hbm [shape: f32[128,128], index: 1, kind: input, shape index: {}]   ;;  %s462_s2 = inlined_call_operand.hbm [shape: f32[8,128], index: 2, kind: output, shape index: {}]  }
   0x1   :  { %8 = vsyncpa [#allocation6], 0 }
   0x2   :  { %9 = vsyncpa [#allocation4], 0  ;;  %s412_s9 = smov [#allocation2]   ;;  %s413_s11 = smov [#allocation5]  }
   0x3   :  { %s16_s10 = sshll.u32 %s412_s9, 4  ;;  %s25_s12 = sshll.u32 %s413_s11, 4  ;;  %s17_s10 = int_to_ptr.vmem [resolvable:$true] %s16_s10  ;;  %s26_s12 = int_to_ptr.vmem [resolvable:$true] %s25_s12 }
   0x4   :  { %s354_s13 = scalar_lea.vmem %s17_s10, 128  ;;  %p359_p1 = scmp.lt.s32.totalorder %s17_s10, %s17_s10 }
   0x5   :  { %p355_p0 = scmp.ne.s32.totalorder %s17_s10, %s354_s13  ;;  %p360_p2 = scmp.lt.s32.totalorder %s354_s13, %s354_s13 }
   0x7   :  { %p361_p3 = por %p360_p2, %p359_p1 }
   0x9   :  { %p362_p4 = pnand %p361_p3, %p355_p0 }
   0xb   :  { %365 = shalt.err (!%p362_p4)
}
   0xc   :  { %19 = dma.hbm_to_vmem [thread:$0]  %s460_s0, 128, %s17_s10, [#allocation3]  }
   0xd   :  { %s374_s16 = scalar_lea.vmem %s26_s12, 2048  ;;  %p379_p6 = scmp.lt.s32.totalorder %s26_s12, %s26_s12 }
   0xe   :  { %p375_p5 = scmp.ne.s32.totalorder %s26_s12, %s374_s16  ;;  %p380_p7 = scmp.lt.s32.totalorder %s374_s16, %s374_s16 }
  0x10   :  { %p381_p8 = por %p380_p7, %p379_p6 }
  0x12   :  { %p382_p9 = pnand %p381_p8, %p375_p5 }
  0x14   :  { %385 = shalt.err (!%p382_p9)
}
  0x15   :  { %s414_s17 = smov 128   ;;  %s415_s18 = smov 8  }
  0x16   :  { %31 = dma.hbm_to_vmem [thread:$0]  %s461_s1, 2048, %s26_s12, [#allocation6], %s414_s17, %s414_s17, %s415_s18  }
  0x17   :  { %406 = dma.done.wait [#allocation3], 128  }
  0x18   :  { %407 = vsyncadd [#allocation3], 4294967168 }
  0x19   :  { %408 = dma.done.wait [#allocation6], 2048  }
  0x1a   :  { %409 = vsyncadd [#allocation6], 4294965248  ;;  %v416_v0 = vmov 0.0   ;;  %vm417_vm0 = vmmov 0   ;;  %v53_v1 = vld [vmem:[#allocation5 + $0x78] sm:$0xff]  ;;  %v52_v2 = vld [vmem:[#allocation5 + $0x70] sm:$0xff] }
  0x1b   :  { %240 = vmatprep.subr.mxu0 %v416_v0  ;;  %272 = vmatprep.mubr.msk.f32.mxu0 %vm417_vm0, %v416_v0  ;;  %v51_v3 = vld [vmem:[#allocation5 + $0x68] sm:$0xff]  ;;  %v69_v4 = vmul.f32 0.5, %v53_v1  ;;  %v68_v5 = vmul.f32 0.5, %v52_v2  ;;  %v50_v7 = vld [vmem:[#allocation5 + $0x60] sm:$0xff]  ;;  %v49_v8 = vld [vmem:[#allocation5 + $0x58] sm:$0xff]  ;;  %s418_s0 = smov [#allocation7]  }
  0x1c   :  { %v67_v6 = vmul.f32 0.5, %v51_v3  ;;  %v48_v9 = vld [vmem:[#allocation5 + $0x50] sm:$0xff]  ;;  %v66_v10 = vmul.f32 0.5, %v50_v7  ;;  %v47_v11 = vld [vmem:[#allocation5 + $0x48] sm:$0xff]  ;;  %v65_v12 = vmul.f32 0.5, %v49_v8  ;;  %v46_v13 = vld [vmem:[#allocation5 + $0x40] sm:$0xff] }
  0x1d   :  { %282 = vtanh.f32 %v69_v4  ;;  %v64_v14 = vmul.f32 0.5, %v48_v9  ;;  %v45_v15 = vld [vmem:[#allocation5 + $0x38] sm:$0xff]  ;;  %v63_v16 = vmul.f32 0.5, %v47_v11  ;;  %v62_v17 = vmul.f32 0.5, %v46_v13  ;;  %v44_v18 = vld [vmem:[#allocation5 + $0x30] sm:$0xff]  ;;  %v43_v20 = vld [vmem:[#allocation5 + $0x28] sm:$0xff] }
  0x1e   :  { %284 = vtanh.f32 %v68_v5  ;;  %v61_v19 = vmul.f32 0.5, %v45_v15  ;;  %v60_v21 = vmul.f32 0.5, %v44_v18  ;;  %v42_v22 = vld [vmem:[#allocation5 + $0x20] sm:$0xff]  ;;  %v59_v23 = vmul.f32 0.5, %v43_v20  ;;  %v41_v24 = vld [vmem:[#allocation5 + $0x18] sm:$0xff]  ;;  %v40_v25 = vld [vmem:[#allocation5 + $0x10] sm:$0xff] }
  0x1f   :  { %286 = vtanh.f32 %v67_v6  ;;  %v58_v26 = vmul.f32 0.5, %v42_v22  ;;  %v39_v27 = vld [vmem:[#allocation5 + $0x8] sm:$0xff]  ;;  %v57_v28 = vmul.f32 0.5, %v41_v24  ;;  %v56_v29 = vmul.f32 0.5, %v40_v25  ;;  %v38_v34 = vld [vmem:[#allocation5] sm:$0xff]  ;;  %s213_s1 = sshll.u32 %s418_s0, 4  ;;  %s214_s1 = int_to_ptr.vmem [resolvable:$true] %s213_s1 }
  0x20   :  { %288 = vtanh.f32 %v66_v10  ;;  %v55_v31 = vmul.f32 0.5, %v39_v27  ;;  %v54_v43 = vmul.f32 0.5, %v38_v34  ;;  %v134_v34 = vld [vmem:[#allocation2] sm:$0xff]  ;;  %s386_s21 = scalar_lea.vmem %s214_s1, 128  ;;  %p391_p11 = scmp.lt.s32.totalorder %s214_s1, %s214_s1 }
  0x21   :  { %290 = vtanh.f32 %v65_v12  ;;  %p387_p10 = scmp.ne.s32.totalorder %s214_s1, %s386_s21  ;;  %p392_p12 = scmp.lt.s32.totalorder %s386_s21, %s386_s21 }
  0x22   :  { %292 = vtanh.f32 %v64_v14 }
  0x23   :  { %294 = vtanh.f32 %v63_v16  ;;  %p393_p13 = por %p392_p12, %p391_p11 }
  0x24   :  { %296 = vtanh.f32 %v62_v17 }
  0x25   :  { %298 = vtanh.f32 %v61_v19  ;;  %p394_p0 = pnand %p393_p13, %p387_p10 }
  0x26   :  { %300 = vtanh.f32 %v60_v21 }
  0x27   :  { %302 = vtanh.f32 %v59_v23 }
  0x28   :  { %304 = vtanh.f32 %v58_v26 }
  0x29   :  { %306 = vtanh.f32 %v57_v28 }
  0x2a   :  { %v283_v30 = vpop.eup %282  ;;  %308 = vtanh.f32 %v56_v29 }
  0x2b   :  { %v285_v32 = vpop.eup %284  ;;  %v101_v33 = vmul.f32 -5.0, %v283_v30  ;;  %310 = vtanh.f32 %v55_v31 }
  0x2c   :  { %v287_v35 = vpop.eup %286  ;;  %v100_v36 = vmul.f32 -5.0, %v285_v32 }
  0x2d   :  { %v289_v37 = vpop.eup %288  ;;  %v132_v38 = vmul.f32 1.442695, %v101_v33  ;;  %v99_v39 = vmul.f32 -5.0, %v287_v35 }
  0x2e   :  { %v291_v40 = vpop.eup %290  ;;  %v130_v41 = vmul.f32 1.442695, %v100_v36  ;;  %v98_v42 = vmul.f32 -5.0, %v289_v37 }
  0x2f   :  { %v293_v44 = vpop.eup %292  ;;  %312 = vpow2.f32 %v132_v38  ;;  %v128_v45 = vmul.f32 1.442695, %v99_v39  ;;  %v97_v46 = vmul.f32 -5.0, %v291_v40 }
  0x30   :  { %v295_v47 = vpop.eup %294  ;;  %314 = vpow2.f32 %v130_v41  ;;  %v126_v48 = vmul.f32 1.442695, %v98_v42  ;;  %v96_v49 = vmul.f32 -5.0, %v293_v44 }
  0x31   :  { %v297_v50 = vpop.eup %296  ;;  %316 = vpow2.f32 %v128_v45  ;;  %v124_v51 = vmul.f32 1.442695, %v97_v46  ;;  %v95_v52 = vmul.f32 -5.0, %v295_v47 }
  0x32   :  { %v299_v53 = vpop.eup %298  ;;  %318 = vtanh.f32 %v54_v43  ;;  %v122_v54 = vmul.f32 1.442695, %v96_v49  ;;  %v94_v55 = vmul.f32 -5.0, %v297_v50 }
  0x33   :  { %320 = vpow2.f32 %v126_v48  ;;  %v301_v56 = vpop.eup %300  ;;  %v120_v57 = vmul.f32 1.442695, %v95_v52  ;;  %v93_v58 = vmul.f32 -5.0, %v299_v53 }
  0x34   :  { %322 = vpow2.f32 %v124_v51  ;;  %v303_v59 = vpop.eup %302  ;;  %v118_v60 = vmul.f32 1.442695, %v94_v55  ;;  %v92_v61 = vmul.f32 -5.0, %v301_v56 }
  0x35   :  { %324 = vpow2.f32 %v122_v54  ;;  %v305_v62 = vpop.eup %304  ;;  %v116_v1 = vmul.f32 1.442695, %v93_v58  ;;  %v91_v2 = vmul.f32 -5.0, %v303_v59 }
  0x36   :  { %v307_v63 = vpop.eup %306  ;;  %326 = vpow2.f32 %v120_v57  ;;  %v114_v5 = vmul.f32 1.442695, %v92_v61  ;;  %v90_v6 = vmul.f32 -5.0, %v305_v62 }
  0x37   :  { %v309_v3 = vpop.eup %308  ;;  %328 = vpow2.f32 %v118_v60  ;;  %v112_v9 = vmul.f32 1.442695, %v91_v2  ;;  %v89_v10 = vmul.f32 -5.0, %v307_v63 }
  0x38   :  { %v311_v4 = vpop.eup %310  ;;  %330 = vpow2.f32 %v116_v1  ;;  %v110_v13 = vmul.f32 1.442695, %v90_v6  ;;  %v88_v14 = vmul.f32 -5.0, %v309_v3 }
  0x39   :  { %332 = vpow2.f32 %v114_v5  ;;  %v108_v16 = vmul.f32 1.442695, %v89_v10  ;;  %v87_v17 = vmul.f32 -5.0, %v311_v4 }
  0x3a   :  { %334 = vpow2.f32 %v112_v9  ;;  %v106_v19 = vmul.f32 1.442695, %v88_v14 }
  0x3b   :  { %336 = vpow2.f32 %v110_v13  ;;  %v104_v22 = vmul.f32 1.442695, %v87_v17 }
  0x3c   :  { %v313_v7 = vpop.eup %312  ;;  %338 = vpow2.f32 %v108_v16 }
  0x3d   :  { %v315_v8 = vpop.eup %314  ;;  %241 = vmatpush3.msra.mxu0 %v313_v7  ;;  %340 = vpow2.f32 %v106_v19 }
  0x3e   :  { %v317_v11 = vpop.eup %316  ;;  %242 = vmatprep.subr.mxu0 %v416_v0  ;;  %342 = vpow2.f32 %v104_v22 }
  0x3f   :  { %v319_v12 = vpop.eup %318  ;;  %243 = vmatpush3.msra.mxu0 %v315_v8 }
  0x40   :  { %v321_v15 = vpop.eup %320  ;;  %244 = vmatprep.subr.mxu0 %v416_v0  ;;  %v86_v20 = vmul.f32 -5.0, %v319_v12 }
  0x41   :  { %245 = vmatpush3.msra.mxu0 %v317_v11  ;;  %v323_v18 = vpop.eup %322 }
  0x42   :  { %246 = vmatprep.subr.mxu0 %v416_v0  ;;  %v325_v21 = vpop.eup %324  ;;  %v102_v24 = vmul.f32 1.442695, %v86_v20 }
  0x43   :  { %247 = vmatpush3.msra.mxu0 %v321_v15  ;;  %v327_v23 = vpop.eup %326 }
  0x44   :  { %248 = vmatprep.subr.mxu0 %v416_v0  ;;  %v329_v25 = vpop.eup %328  ;;  %344 = vpow2.f32 %v102_v24 }
  0x45   :  { %249 = vmatpush3.msra.mxu0 %v323_v18  ;;  %v331_v26 = vpop.eup %330 }
  0x46   :  { %250 = vmatprep.subr.mxu0 %v416_v0  ;;  %v333_v27 = vpop.eup %332 }
  0x47   :  { %251 = vmatpush3.msra.mxu0 %v325_v21  ;;  %v335_v28 = vpop.eup %334 }
  0x48   :  { %252 = vmatprep.subr.mxu0 %v416_v0  ;;  %v337_v29 = vpop.eup %336 }
  0x49   :  { %253 = vmatpush3.msra.mxu0 %v327_v23  ;;  %v339_v30 = vpop.eup %338 }
  0x4a   :  { %254 = vmatprep.subr.mxu0 %v416_v0  ;;  %v341_v31 = vpop.eup %340 }
  0x4b   :  { %255 = vmatpush3.msra.mxu0 %v329_v25  ;;  %v343_v32 = vpop.eup %342 }
  0x4c   :  { %256 = vmatprep.subr.mxu0 %v416_v0 }
  0x4d   :  { %257 = vmatpush3.msra.mxu0 %v331_v26 }
  0x4e   :  { %258 = vmatprep.subr.mxu0 %v416_v0 }
  0x4f   :  { %259 = vmatpush3.msra.mxu0 %v333_v27 }
  0x50   :  { %260 = vmatprep.subr.mxu0 %v416_v0 }
  0x51   :  { %261 = vmatpush3.msra.mxu0 %v335_v28  ;;  %v345_v33 = vpop.eup %344 }
  0x52   :  { %262 = vmatprep.subr.mxu0 %v416_v0 }
  0x53   :  { %263 = vmatpush3.msra.mxu0 %v337_v29 }
  0x54   :  { %264 = vmatprep.subr.mxu0 %v416_v0 }
  0x55   :  { %265 = vmatpush3.msra.mxu0 %v339_v30 }
  0x56   :  { %266 = vmatprep.subr.mxu0 %v416_v0 }
  0x57   :  { %267 = vmatpush3.msra.mxu0 %v341_v31 }
  0x58   :  { %268 = vmatprep.subr.mxu0 %v416_v0 }
  0x59   :  { %269 = vmatpush3.msra.mxu0 %v343_v32 }
  0x5a   :  { %270 = vmatprep.subr.mxu0 %v416_v0 }
  0x5b   :  { %271 = vmatpush3.msra.mxu0 %v345_v33 }
  0x5c   :  { %273 = vmatmul.mubr.f32.vlgmr.msra.gmra.mxu0 %v134_v34 }
 0x11c   :  { %v201_v35 = vpop.f32.mrf.mxu0 }
 0x11d   :  { %v205_v36 = vmul.f32 0.006737947, %v201_v35 }
 0x11e   :  { %v274_v37 = vpop.f32.mrf.mxu0 }
 0x11f   :  { %206 = vst [vmem:[#allocation7] sm:$0xff] %v205_v36 }
 0x120   :  { %397 = shalt.err (!%p394_p0)
}
 0x121   :  { %216 = dma.vmem_to_hbm [thread:$0]  %s214_s1, 128, %s462_s2, [#allocation4]  }
 0x122   :  { %410 = dma.done.wait [#allocation4], 128  }
 0x123   :  { %411 = vsyncadd [#allocation4], 4294967168 }
 0x124   :  { %220 = vsyncpa [#allocation3], 1 }
 0x125   :  { %221 = vsyncpa [#allocation6], 1 }
 0x126   :  { %222 = vsyncpa [#allocation4], 1 }

</bundles_post_ra>
